<compile_context>
chip_gen: v7x
topology: tpu7x:2x2x1
jax: 0.10.0
libtpu: 0.0.40
codegen_flags: <defaults>
</compile_context>

<pallas_src>
import functools

import jax
import jax.numpy as jnp
from jax.experimental import pallas as pl
from jax.experimental.pallas import tpu as pltpu


def _mha_kernel(xq_ref, xkv_ref, wq_ref, wkv_ref, wp_ref, bp_ref, o_ref,
                kv_ref, *, num_heads, head_size, scale, causal):
    c = num_heads * head_size
    in_dtype = xq_ref.dtype

    # --- K/V projection for the full sequence: once per batch element ------
    # Computed at the first query tile and kept resident in VMEM scratch for
    # all remaining query tiles of this batch element (q axis is "arbitrary",
    # so iterations are sequential and the scratch persists).
    @pl.when(pl.program_id(1) == 0)
    def _():
        kv_ref[...] = jnp.dot(
            xkv_ref[0], wkv_ref[...],
            preferred_element_type=jnp.float32).astype(in_dtype)

    xq = xq_ref[0]                       # (tq, C)  query rows for this tile
    tq = xq.shape[0]
    seq = kv_ref.shape[0]

    # --- Q projection (fold the scale into Q: tq*C mul, not H*tq*T muls) ---
    q = jnp.dot(xq, wq_ref[...], preferred_element_type=jnp.float32)
    q = (q * scale).astype(in_dtype)
    kv = kv_ref[...]                     # (T, 2C) in input dtype

    if causal:
        row = pl.program_id(1) * tq + jax.lax.broadcasted_iota(
            jnp.int32, (tq, seq), 0)
        col = jax.lax.broadcasted_iota(jnp.int32, (tq, seq), 1)
        causal_mask = col <= row

    ctxs = []
    for h in range(num_heads):
        lo, hi = h * head_size, (h + 1) * head_size
        qh = q[:, lo:hi]                                     # (tq, hs)
        kh = kv[:, lo:hi]                                    # (T,  hs)
        vh = kv[:, c + lo:c + hi]                            # (T,  hs)

        # scores = (q * C^-0.5) @ k^T  (contract head dim, no transpose op)
        s = jax.lax.dot_general(
            qh, kh, (((1,), (1,)), ((), ())),
            preferred_element_type=jnp.float32)              # (tq, T) f32
        if causal:
            s = jnp.where(causal_mask, s, -jnp.inf)

        # softmax in f32 (attention-weight dropout = identity in eval mode)
        m = jnp.max(s, axis=-1, keepdims=True)
        p = jnp.exp(s - m)                                   # values in [0, 1]
        denom = jnp.sum(p, axis=-1, keepdims=True)

        ctx = jnp.dot(p.astype(in_dtype), vh,
                      preferred_element_type=jnp.float32)    # (tq, hs)
        # Normalize AFTER P@V: (tq, hs) mul instead of (tq, T) mul.
        ctx = ctx * pl.reciprocal(denom, approx=False)
        ctxs.append(ctx.astype(in_dtype))

    # concat(heads) then ONE full-K output projection (much better MXU
    # utilization than num_heads narrow-K (hs, C) matmuls).
    ctx_all = jnp.concatenate(ctxs, axis=-1)                 # (tq, C)
    out = jnp.dot(ctx_all, wp_ref[...],
                  preferred_element_type=jnp.float32) + bp_ref[...]
    o_ref[0] = out.astype(o_ref.dtype)                       # lane-dense store


def multi_head_attention_forward(x, params, *, num_heads, is_decoder=False,
                                 block_q=256):
    """x: (B, T, C).  params: wq (C,C), wk (C,C), wv (C,C), wp (C,C), bp (1,C).

    Per-head columns of wq/wk/wv: head h uses columns [h*hs, (h+1)*hs).
    """
    b, t, c = x.shape
    assert c % num_heads == 0
    hs = c // num_heads
    scale = float(c) ** -0.5            # PyTorch scales by n_embd ** -0.5

    # Explicit query tile: multiple of 8 and divides T, else fall back to T.
    if block_q is not None and block_q <= t and t % block_q == 0 and block_q % 8 == 0:
        tq = block_q
    else:
        tq = t

    # Fuse K and V projections into one (C, 2C) matmul operand.
    wkv = jnp.concatenate([params["wk"], params["wv"]], axis=1)

    kernel = functools.partial(
        _mha_kernel, num_heads=num_heads, head_size=hs, scale=scale,
        causal=is_decoder)

    grid_spec = pltpu.PrefetchScalarGridSpec(
        num_scalar_prefetch=0,
        grid=(b, t // tq),
        in_specs=[
            pl.BlockSpec((1, tq, c), lambda bi, qi: (bi, qi, 0)),  # x (query tile)
            pl.BlockSpec((1, t, c), lambda bi, qi: (bi, 0, 0)),    # x (full K/V rows)
            pl.BlockSpec((c, c), lambda bi, qi: (0, 0)),           # Wq
            pl.BlockSpec((c, 2 * c), lambda bi, qi: (0, 0)),       # Wk|Wv fused
            pl.BlockSpec((c, c), lambda bi, qi: (0, 0)),           # Wp
            pl.BlockSpec((1, c), lambda bi, qi: (0, 0)),           # bp
        ],
        out_specs=pl.BlockSpec((1, tq, c), lambda bi, qi: (bi, qi, 0)),
        scratch_shapes=[pltpu.VMEM((t, 2 * c), x.dtype)],          # K|V per batch
    )

    return pl.pallas_call(
        kernel,
        out_shape=jax.ShapeDtypeStruct((b, t, c), x.dtype),
        grid_spec=grid_spec,
        compiler_params=pltpu.CompilerParams(
            dimension_semantics=("parallel", "arbitrary")),
    )(x, x, params["wq"], wkv, params["wp"], params["bp"])


def _reference(x, params, *, num_heads, is_decoder=False):
    """Pure-JAX reference mirroring the PyTorch forward (eval mode)."""
    b, t, c = x.shape
    hs = c // num_heads
    scale = float(c) ** -0.5
    q = x @ params["wq"]
    k = x @ params["wk"]
    v = x @ params["wv"]
    outs = []
    for h in range(num_heads):
        lo, hi = h * hs, (h + 1) * hs
        qh, kh, vh = q[..., lo:hi], k[..., lo:hi], v[..., lo:hi]
        wei = jnp.einsum("btd,bsd->bts", qh, kh) * scale
        if is_decoder:
            mask = jnp.tril(jnp.ones((t, t), dtype=bool))
            wei = jnp.where(mask, wei, -jnp.inf)
        wei = jax.nn.softmax(wei, axis=-1)
        outs.append(jnp.einsum("bts,bsd->btd", wei, vh))
    out = jnp.concatenate(outs, axis=-1)
    return out @ params["wp"] + params["bp"][0]


if __name__ == "__main__":
    # Small config: batch=2, seq=8, n_embed=32, num_heads=4 (head_size=8)
    B, T, C = 2, 8, 32
    H = 4

    key = jax.random.PRNGKey(0)
    keys = jax.random.split(key, 8)

    x = jax.random.normal(keys[0], (B, T, C), dtype=jnp.float32)

    def lin_init(kw, fan_in, shape):
        bound = 1.0 / jnp.sqrt(fan_in)
        return jax.random.uniform(kw, shape, jnp.float32, -bound, bound)

    params = dict(
        wq=lin_init(keys[1], C, (C, C)),
        wk=lin_init(keys[2], C, (C, C)),
        wv=lin_init(keys[3], C, (C, C)),
        wp=lin_init(keys[4], C, (C, C)),
        bp=lin_init(keys[5], C, (1, C)),
    )

    # Encoder-style (module default is_decoder=False)
    out = multi_head_attention_forward(x, params, num_heads=H, is_decoder=False)
    jax.block_until_ready(out)
    ref = _reference(x, params, num_heads=H, is_decoder=False)
    assert jnp.allclose(out, ref, atol=1e-4, rtol=1e-4), "mismatch (encoder)"

    # Decoder-style (causal mask path)
    out_c = multi_head_attention_forward(x, params, num_heads=H, is_decoder=True)
    jax.block_until_ready(out_c)
    ref_c = _reference(x, params, num_heads=H, is_decoder=True)
    assert jnp.allclose(out_c, ref_c, atol=1e-4, rtol=1e-4), "mismatch (decoder)"

    print("KERNEL_OK")
</pallas_src>

<mosaic_0001>
module attributes {stable_mosaic.version = 11 : i64} {
  func.func @_mha_kernel(%arg0: i32, %arg1: i32, %arg2: memref<1x8x32xf32, #tpu.memory_space<vmem>>, %arg3: memref<1x8x32xf32, #tpu.memory_space<vmem>>, %arg4: memref<32x32xf32, #tpu.memory_space<vmem>>, %arg5: memref<32x64xf32, #tpu.memory_space<vmem>>, %arg6: memref<32x32xf32, #tpu.memory_space<vmem>>, %arg7: memref<1x32xf32, #tpu.memory_space<vmem>>, %arg8: memref<1x8x32xf32, #tpu.memory_space<vmem>>, %arg9: memref<8x64xf32, #tpu.memory_space<vmem>>) attributes {dimension_semantics = [#tpu.dimension_semantics<parallel>, #tpu.dimension_semantics<arbitrary>], iteration_bounds = array<i64: 2, 1>, scalar_prefetch = 0 : i64, scratch_operands = 1 : i64, tpu.core_type = #tpu.core_type<tc>, window_params = [{transform_indices = @transform_0, window_bounds = array<i64: 1, 8, 32>}, {transform_indices = @transform_1, window_bounds = array<i64: 1, 8, 32>}, {pipeline_mode = #tpu.pipeline_mode<synchronous>, transform_indices = @transform_2, window_bounds = array<i64: 32, 32>}, {pipeline_mode = #tpu.pipeline_mode<synchronous>, transform_indices = @transform_3, window_bounds = array<i64: 32, 64>}, {pipeline_mode = #tpu.pipeline_mode<synchronous>, transform_indices = @transform_4, window_bounds = array<i64: 32, 32>}, {pipeline_mode = #tpu.pipeline_mode<synchronous>, transform_indices = @transform_5, window_bounds = array<i64: 1, 32>}, {transform_indices = @transform_6, window_bounds = array<i64: 1, 8, 32>}]} {
    %c0_i32 = arith.constant 0 : i32
    %0 = arith.cmpi eq, %arg1, %c0_i32 : i32
    %1 = arith.extui %0 : i1 to i32
    %c0_i32_0 = arith.constant 0 : i32
    %2 = arith.cmpi ne, %1, %c0_i32_0 : i32
    scf.if %2 {
      %c0_32 = arith.constant 0 : index
      %c0_33 = arith.constant 0 : index
      %c0_34 = arith.constant 0 : index
      %79 = vector.load %arg3[%c0_32, %c0_33, %c0_34] : memref<1x8x32xf32, #tpu.memory_space<vmem>>, vector<1x8x32xf32>
      %80 = vector.shape_cast %79 : vector<1x8x32xf32> to vector<8x32xf32>
      %c0_35 = arith.constant 0 : index
      %c0_36 = arith.constant 0 : index
      %81 = vector.load %arg5[%c0_35, %c0_36] : memref<32x64xf32, #tpu.memory_space<vmem>>, vector<32x64xf32>
      %cst_37 = arith.constant dense<0.000000e+00> : vector<8x64xf32>
      %82 = tpu.matmul %80, %81, %cst_37 {dimension_numbers = #tpu.dot_dimension_numbers<[1], [0], [0], [1], [0, 0, 1, 1], [], []>} : vector<8x32xf32>, vector<32x64xf32>, vector<8x64xf32> -> vector<8x64xf32>
      %c0_38 = arith.constant 0 : index
      %c0_39 = arith.constant 0 : index
      %83 = vector.load %arg9[%c0_38, %c0_39] : memref<8x64xf32, #tpu.memory_space<vmem>>, vector<8x64xf32>
      tpu.vector_store %arg9[%c0_38, %c0_39], %82 {strides = array<i32>} : memref<8x64xf32, #tpu.memory_space<vmem>>, vector<8x64xf32>,
    } else {
    }
    %c0 = arith.constant 0 : index
    %c0_1 = arith.constant 0 : index
    %c0_2 = arith.constant 0 : index
    %3 = vector.load %arg2[%c0, %c0_1, %c0_2] : memref<1x8x32xf32, #tpu.memory_space<vmem>>, vector<1x8x32xf32>
    %4 = vector.shape_cast %3 : vector<1x8x32xf32> to vector<8x32xf32>
    %c0_3 = arith.constant 0 : index
    %c0_4 = arith.constant 0 : index
    %5 = vector.load %arg4[%c0_3, %c0_4] : memref<32x32xf32, #tpu.memory_space<vmem>>, vector<32x32xf32>
    %cst = arith.constant dense<0.000000e+00> : vector<8x32xf32>
    %6 = tpu.matmul %4, %5, %cst {dimension_numbers = #tpu.dot_dimension_numbers<[1], [0], [0], [1], [0, 0, 1, 1], [], []>} : vector<8x32xf32>, vector<32x32xf32>, vector<8x32xf32> -> vector<8x32xf32>
    %cst_5 = arith.constant 0.176776692 : f32
    %7 = vector.broadcast %cst_5 : f32 to vector<8x32xf32>
    %8 = arith.mulf %6, %7 : vector<8x32xf32>
    %c0_6 = arith.constant 0 : index
    %c0_7 = arith.constant 0 : index
    %9 = vector.load %arg9[%c0_6, %c0_7] : memref<8x64xf32, #tpu.memory_space<vmem>>, vector<8x64xf32>
    %10 = vector.extract_strided_slice %8 {offsets = [0, 0], sizes = [8, 8], strides = [1, 1]} : vector<8x32xf32> to vector<8x8xf32>
    %11 = vector.extract_strided_slice %9 {offsets = [0, 0], sizes = [8, 8], strides = [1, 1]} : vector<8x64xf32> to vector<8x8xf32>
    %12 = vector.extract_strided_slice %9 {offsets = [0, 32], sizes = [8, 8], strides = [1, 1]} : vector<8x64xf32> to vector<8x8xf32>
    %cst_8 = arith.constant dense<0.000000e+00> : vector<8x8xf32>
    %13 = tpu.matmul %10, %11, %cst_8 {dimension_numbers = #tpu.dot_dimension_numbers<[1], [1], [0], [0], [0, 0, 1, 0], [], []>} : vector<8x8xf32>, vector<8x8xf32>, vector<8x8xf32> -> vector<8x8xf32>
    %cst_9 = arith.constant dense<0xFF800000> : vector<8xf32>
    %14 = vector.multi_reduction <maximumf>, %13, %cst_9 [1] : vector<8x8xf32> to vector<8xf32>
    %15 = vector.shape_cast %14 : vector<8xf32> to vector<8x1xf32>
    %16 = vector.broadcast %15 : vector<8x1xf32> to vector<8x8xf32>
    %17 = arith.subf %13, %16 : vector<8x8xf32>
    %18 = math.exp %17 : vector<8x8xf32>
    %cst_10 = arith.constant dense<0.000000e+00> : vector<8xf32>
    %19 = vector.multi_reduction <add>, %18, %cst_10 [1] : vector<8x8xf32> to vector<8xf32>
    %20 = vector.shape_cast %19 : vector<8xf32> to vector<8x1xf32>
    %cst_11 = arith.constant dense<0.000000e+00> : vector<8x8xf32>
    %21 = tpu.matmul %18, %12, %cst_11 {dimension_numbers = #tpu.dot_dimension_numbers<[1], [0], [0], [1], [0, 0, 1, 1], [], []>} : vector<8x8xf32>, vector<8x8xf32>, vector<8x8xf32> -> vector<8x8xf32>
    %22 = tpu.reciprocal %20 : vector<8x1xf32> -> vector<8x1xf32>
    %23 = vector.broadcast %22 : vector<8x1xf32> to vector<8x8xf32>
    %24 = arith.mulf %21, %23 : vector<8x8xf32>
    %25 = vector.extract_strided_slice %8 {offsets = [0, 8], sizes = [8, 8], strides = [1, 1]} : vector<8x32xf32> to vector<8x8xf32>
    %26 = vector.extract_strided_slice %9 {offsets = [0, 8], sizes = [8, 8], strides = [1, 1]} : vector<8x64xf32> to vector<8x8xf32>
    %27 = vector.extract_strided_slice %9 {offsets = [0, 40], sizes = [8, 8], strides = [1, 1]} : vector<8x64xf32> to vector<8x8xf32>
    %cst_12 = arith.constant dense<0.000000e+00> : vector<8x8xf32>
    %28 = tpu.matmul %25, %26, %cst_12 {dimension_numbers = #tpu.dot_dimension_numbers<[1], [1], [0], [0], [0, 0, 1, 0], [], []>} : vector<8x8xf32>, vector<8x8xf32>, vector<8x8xf32> -> vector<8x8xf32>
    %cst_13 = arith.constant dense<0xFF800000> : vector<8xf32>
    %29 = vector.multi_reduction <maximumf>, %28, %cst_13 [1] : vector<8x8xf32> to vector<8xf32>
    %30 = vector.shape_cast %29 : vector<8xf32> to vector<8x1xf32>
    %31 = vector.broadcast %30 : vector<8x1xf32> to vector<8x8xf32>
    %32 = arith.subf %28, %31 : vector<8x8xf32>
    %33 = math.exp %32 : vector<8x8xf32>
    %cst_14 = arith.constant dense<0.000000e+00> : vector<8xf32>
    %34 = vector.multi_reduction <add>, %33, %cst_14 [1] : vector<8x8xf32> to vector<8xf32>
    %35 = vector.shape_cast %34 : vector<8xf32> to vector<8x1xf32>
    %cst_15 = arith.constant dense<0.000000e+00> : vector<8x8xf32>
    %36 = tpu.matmul %33, %27, %cst_15 {dimension_numbers = #tpu.dot_dimension_numbers<[1], [0], [0], [1], [0, 0, 1, 1], [], []>} : vector<8x8xf32>, vector<8x8xf32>, vector<8x8xf32> -> vector<8x8xf32>
    %37 = tpu.reciprocal %35 : vector<8x1xf32> -> vector<8x1xf32>
    %38 = vector.broadcast %37 : vector<8x1xf32> to vector<8x8xf32>
    %39 = arith.mulf %36, %38 : vector<8x8xf32>
    %40 = vector.extract_strided_slice %8 {offsets = [0, 16], sizes = [8, 8], strides = [1, 1]} : vector<8x32xf32> to vector<8x8xf32>
    %41 = vector.extract_strided_slice %9 {offsets = [0, 16], sizes = [8, 8], strides = [1, 1]} : vector<8x64xf32> to vector<8x8xf32>
    %42 = vector.extract_strided_slice %9 {offsets = [0, 48], sizes = [8, 8], strides = [1, 1]} : vector<8x64xf32> to vector<8x8xf32>
    %cst_16 = arith.constant dense<0.000000e+00> : vector<8x8xf32>
    %43 = tpu.matmul %40, %41, %cst_16 {dimension_numbers = #tpu.dot_dimension_numbers<[1], [1], [0], [0], [0, 0, 1, 0], [], []>} : vector<8x8xf32>, vector<8x8xf32>, vector<8x8xf32> -> vector<8x8xf32>
    %cst_17 = arith.constant dense<0xFF800000> : vector<8xf32>
    %44 = vector.multi_reduction <maximumf>, %43, %cst_17 [1] : vector<8x8xf32> to vector<8xf32>
    %45 = vector.shape_cast %44 : vector<8xf32> to vector<8x1xf32>
    %46 = vector.broadcast %45 : vector<8x1xf32> to vector<8x8xf32>
    %47 = arith.subf %43, %46 : vector<8x8xf32>
    %48 = math.exp %47 : vector<8x8xf32>
    %cst_18 = arith.constant dense<0.000000e+00> : vector<8xf32>
    %49 = vector.multi_reduction <add>, %48, %cst_18 [1] : vector<8x8xf32> to vector<8xf32>
    %50 = vector.shape_cast %49 : vector<8xf32> to vector<8x1xf32>
    %cst_19 = arith.constant dense<0.000000e+00> : vector<8x8xf32>
    %51 = tpu.matmul %48, %42, %cst_19 {dimension_numbers = #tpu.dot_dimension_numbers<[1], [0], [0], [1], [0, 0, 1, 1], [], []>} : vector<8x8xf32>, vector<8x8xf32>, vector<8x8xf32> -> vector<8x8xf32>
    %52 = tpu.reciprocal %50 : vector<8x1xf32> -> vector<8x1xf32>
    %53 = vector.broadcast %52 : vector<8x1xf32> to vector<8x8xf32>
    %54 = arith.mulf %51, %53 : vector<8x8xf32>
    %55 = vector.extract_strided_slice %8 {offsets = [0, 24], sizes = [8, 8], strides = [1, 1]} : vector<8x32xf32> to vector<8x8xf32>
    %56 = vector.extract_strided_slice %9 {offsets = [0, 24], sizes = [8, 8], strides = [1, 1]} : vector<8x64xf32> to vector<8x8xf32>
    %57 = vector.extract_strided_slice %9 {offsets = [0, 56], sizes = [8, 8], strides = [1, 1]} : vector<8x64xf32> to vector<8x8xf32>
    %cst_20 = arith.constant dense<0.000000e+00> : vector<8x8xf32>
    %58 = tpu.matmul %55, %56, %cst_20 {dimension_numbers = #tpu.dot_dimension_numbers<[1], [1], [0], [0], [0, 0, 1, 0], [], []>} : vector<8x8xf32>, vector<8x8xf32>, vector<8x8xf32> -> vector<8x8xf32>
    %cst_21 = arith.constant dense<0xFF800000> : vector<8xf32>
    %59 = vector.multi_reduction <maximumf>, %58, %cst_21 [1] : vector<8x8xf32> to vector<8xf32>
    %60 = vector.shape_cast %59 : vector<8xf32> to vector<8x1xf32>
    %61 = vector.broadcast %60 : vector<8x1xf32> to vector<8x8xf32>
    %62 = arith.subf %58, %61 : vector<8x8xf32>
    %63 = math.exp %62 : vector<8x8xf32>
    %cst_22 = arith.constant dense<0.000000e+00> : vector<8xf32>
    %64 = vector.multi_reduction <add>, %63, %cst_22 [1] : vector<8x8xf32> to vector<8xf32>
    %65 = vector.shape_cast %64 : vector<8xf32> to vector<8x1xf32>
    %cst_23 = arith.constant dense<0.000000e+00> : vector<8x8xf32>
    %66 = tpu.matmul %63, %57, %cst_23 {dimension_numbers = #tpu.dot_dimension_numbers<[1], [0], [0], [1], [0, 0, 1, 1], [], []>} : vector<8x8xf32>, vector<8x8xf32>, vector<8x8xf32> -> vector<8x8xf32>
    %67 = tpu.reciprocal %65 : vector<8x1xf32> -> vector<8x1xf32>
    %68 = vector.broadcast %67 : vector<8x1xf32> to vector<8x8xf32>
    %69 = arith.mulf %66, %68 : vector<8x8xf32>
    %70 = tpu.concatenate %24, %39, %54, %69 in 1 : vector<8x8xf32>, vector<8x8xf32>, vector<8x8xf32>, vector<8x8xf32> -> vector<8x32xf32>
    %c0_24 = arith.constant 0 : index
    %c0_25 = arith.constant 0 : index
    %71 = vector.load %arg6[%c0_24, %c0_25] : memref<32x32xf32, #tpu.memory_space<vmem>>, vector<32x32xf32>
    %cst_26 = arith.constant dense<0.000000e+00> : vector<8x32xf32>
    %72 = tpu.matmul %70, %71, %cst_26 {dimension_numbers = #tpu.dot_dimension_numbers<[1], [0], [0], [1], [0, 0, 1, 1], [], []>} : vector<8x32xf32>, vector<32x32xf32>, vector<8x32xf32> -> vector<8x32xf32>
    %c0_27 = arith.constant 0 : index
    %c0_28 = arith.constant 0 : index
    %73 = vector.load %arg7[%c0_27, %c0_28] : memref<1x32xf32, #tpu.memory_space<vmem>>, vector<1x32xf32>
    %74 = vector.broadcast %73 : vector<1x32xf32> to vector<8x32xf32>
    %75 = arith.addf %72, %74 : vector<8x32xf32>
    %c0_29 = arith.constant 0 : index
    %c0_30 = arith.constant 0 : index
    %c0_31 = arith.constant 0 : index
    %76 = vector.load %arg8[%c0_29, %c0_30, %c0_31] : memref<1x8x32xf32, #tpu.memory_space<vmem>>, vector<1x8x32xf32>
    %77 = vector.shape_cast %76 : vector<1x8x32xf32> to vector<8x32xf32>
    %78 = vector.shape_cast %75 : vector<8x32xf32> to vector<1x8x32xf32>
    tpu.vector_store %arg8[%c0_29, %c0_30, %c0_31], %78 {strides = array<i32>} : memref<1x8x32xf32, #tpu.memory_space<vmem>>, vector<1x8x32xf32>,
    return
  }
  func.func @transform_0(%arg0: i32, %arg1: i32) -> (i32, i32, i32) {
    %c0_i32 = arith.constant 0 : i32
    %c0_i32_0 = arith.constant 0 : i32
    return %arg0, %arg1, %c0_i32 : i32, i32, i32
  }
  func.func @transform_1(%arg0: i32, %arg1: i32) -> (i32, i32, i32) {
    %c0_i32 = arith.constant 0 : i32
    %c0_i32_0 = arith.constant 0 : i32
    %c0_i32_1 = arith.constant 0 : i32
    return %arg0, %c0_i32, %c0_i32_0 : i32, i32, i32
  }
  func.func @transform_2(%arg0: i32, %arg1: i32) -> (i32, i32) {
    %c0_i32 = arith.constant 0 : i32
    %c0_i32_0 = arith.constant 0 : i32
    %c0_i32_1 = arith.constant 0 : i32
    return %c0_i32, %c0_i32_0 : i32, i32
  }
  func.func @transform_3(%arg0: i32, %arg1: i32) -> (i32, i32) {
    %c0_i32 = arith.constant 0 : i32
    %c0_i32_0 = arith.constant 0 : i32
    %c0_i32_1 = arith.constant 0 : i32
    return %c0_i32, %c0_i32_0 : i32, i32
  }
  func.func @transform_4(%arg0: i32, %arg1: i32) -> (i32, i32) {
    %c0_i32 = arith.constant 0 : i32
    %c0_i32_0 = arith.constant 0 : i32
    %c0_i32_1 = arith.constant 0 : i32
    return %c0_i32, %c0_i32_0 : i32, i32
  }
  func.func @transform_5(%arg0: i32, %arg1: i32) -> (i32, i32) {
    %c0_i32 = arith.constant 0 : i32
    %c0_i32_0 = arith.constant 0 : i32
    %c0_i32_1 = arith.constant 0 : i32
    return %c0_i32, %c0_i32_0 : i32, i32
  }
  func.func @transform_6(%arg0: i32, %arg1: i32) -> (i32, i32, i32) {
    %c0_i32 = arith.constant 0 : i32
    %c0_i32_0 = arith.constant 0 : i32
    return %arg0, %arg1, %c0_i32 : i32, i32, i32
  }
}

</mosaic_0001>

<bundles_post_ra>
// kernel: tpu_custom_call.1
= control target key start
LH: loop header
LB: loop body
LE: loop exit
PB: predicated region body
PF: predicated region fallthrough
CT: control target
= control target key end

     0   :  { %s2411_s0 = inlined_call_operand.hbm [shape: f32[2,8,32], index: 0, kind: input, shape index: {}]   ;;  %s2412_s1 = inlined_call_operand.hbm [shape: f32[2,8,32], index: 1, kind: input, shape index: {}]   ;;  %s2413_s2 = inlined_call_operand.hbm [shape: f32[32,32], index: 2, kind: input, shape index: {}]   ;;  %s2414_s3 = inlined_call_operand.hbm [shape: f32[32,64], index: 3, kind: input, shape index: {}]   ;;  %s2415_s4 = inlined_call_operand.hbm [shape: f32[32,32], index: 4, kind: input, shape index: {}]   ;;  %s2416_s5 = inlined_call_operand.vmem [shape: f32[1,32], index: 5, kind: input, shape index: {}]   ;;  %s2417_s6 = inlined_call_operand.hbm [shape: f32[2,8,32], index: 6, kind: output, shape index: {}]  }
   0x1   :  { %2424 = sst [smem:[#allocation20_spill]] %s2413_s2 }
   0x2   :  { %2425 = sst [smem:[#allocation21_spill]] %s2414_s3 }
   0x3   :  { %2426 = sst [smem:[#allocation22_spill]] %s2415_s4 }
   0x4   :  { %11 = vsyncpa [#allocation4], 0 }
   0x5   :  { %13 = vsyncpa [#allocation4 + $0x1], 0 }
   0x6   :  { %14 = vsyncpa [#allocation7], 0 }
   0x7   :  { %16 = vsyncpa [#allocation7 + $0x1], 0 }
   0x8   :  { %17 = vsyncpa [#allocation10], 0 }
   0x9   :  { %18 = vsyncpa [#allocation5], 0 }
   0xa   :  { %20 = vsyncpa [#allocation5 + $0x1], 0  ;;  %s2022_s21 = smov 0   ;;  %s2024_s22 = smov 0  }
   0xb   :  { %s2026_s23 = smov 0   ;;  %s2028_s24 = smov 0  }
   0xc   :  { %s2030_s25 = smov 0   ;;  %s2032_s26 = smov 0  }
   0xd LB: > { %2427 = sst [smem:[#allocation18_spill]] %s1944_s21  ;;  %s2053_s27 = sadd.s32 4294967295, %s1964_s26   ;;  %s1964_s26 = sphi %s2032_s26, %s26_s26   ;;  %s1960_s25 = sphi %s2030_s25, %s2455_s25   ;;  %s1956_s24 = sphi %s2028_s24, %s2454_s24   ;;  %s1952_s23 = sphi %s2026_s23, %s2453_s23   ;;  %s1948_s22 = sphi %s2024_s22, %s2452_s22   ;;  %s1944_s21 = sphi %s2022_s21, %s2451_s21  }
   0xe   : > { %s1438_s28 = sadd.s32 4294967294, %s1964_s26   ;;  %p60_p0 = scmp.ne.s32.totalorder %s1948_s22, %s1944_s21 }
   0xf   : > { %p2418_p1 = scmp.eq.s32.totalorder %s2053_s27, 0  ;;  %p202_p3 = scmp.eq.s32.totalorder %s1438_s28, 1 }
  0x10   : > { %p1439_p5 = scmp.ge.s32.totalorder %s1964_s26, 1  ;;  %p209_p7 = scmp.lt.s32.totalorder %s1964_s26, 3 }
  0x11   : > { %p2062_p4 = por %p2418_p1, %p60_p0  ;;  %p2067_p6 = por %p202_p3, %p60_p0 }
  0x12   : > { %p2072_p8 = pnand %p1439_p5, %p209_p7  ;;  %s1966_s8 = smov [#allocation8]  }
  0x13   : > { %s2428_s29 = scalar_select %p2062_p4, 1, 0 }
  0x14   : > { %s2429_s30 = scalar_select %p2067_p6, 1, 0 }
  0x15   : > { %s2431_s7 = scalar_select %p2072_p8, 1, 0 }
  0x16   : > { %2430 = sst [smem:[#allocation19_spill]] %s2429_s30  ;;  %s221_s9 = sshll.u32 %s1966_s8, 4  ;;  %s2076_s9 = int_to_ptr.vmem [resolvable:$true] %s221_s9 }
  0x17   : > { %p1615_p9 = pneg %p2072_p8  ;;  %s1967_s11 = smov [#allocation9]  }
  0x18   : > { %s234_s12 = sshll.u32 %s1967_s11, 4  ;;  %s1968_s13 = smov [#allocation11]   ;;  %s2087_s12 = int_to_ptr.vmem [resolvable:$true] %s234_s12 }
  0x19   : > { %p2083_p11 = pnand %p1615_p9, %p2418_p1  ;;  %s2089_s14 = sshll.u32 %s1968_s13, 4  ;;  %s248_s14 = int_to_ptr.vmem [resolvable:$true] %s2089_s14 }
  0x1a   : > { %s2433_s2 = sld [smem:[#allocation20_spill]] }
  0x1b   : > { %p2099_p13 = pneg %p2083_p11 }
  0x20   : > { %s1726_s17 = scalar_lea.hbm %s2433_s2, 512 }
  0x21   : > { %p1727_p12 = scmp.ne.s32.totalorder %s2433_s2, %s1726_s17  ;;  %p1733_p5 = scmp.lt.u32.totalorder %s1726_s17, %s2433_s2 }
  0x23   : > { %p1729_p0 = pnand %p2099_p13, %p1727_p12 }
  0x25   : > { %p1730_p3 = pneg %p1729_p0 }
  0x27   : > { %p1735_p7 = pnand %p1733_p5, %p1730_p3 }
  0x29   : > { %1738 = shalt.err (!%p1735_p7)
}
  0x2a   : > { %s1739_s11 = scalar_lea.vmem %s2076_s9, 512  ;;  %p1747_p2 = scmp.lt.s32.totalorder %s2076_s9, %s2076_s9 }
  0x2b   : > { %p1740_p9 = scmp.ne.s32.totalorder %s2076_s9, %s1739_s11  ;;  %p1748_p6 = scmp.lt.s32.totalorder %s1739_s11, %s1739_s11 }
  0x2d   : > { %p1742_p10 = pnand %p1740_p9, %p2099_p13  ;;  %p1749_p12 = por %p1748_p6, %p1747_p2 }
  0x2f   : > { %p1743_p1 = pneg %p1742_p10 }
  0x31   : > { %p1750_p0 = pnand %p1749_p12, %p1743_p1 }
  0x33   : > { %1753 = shalt.err (!%p1750_p0)
}
  0x34   : > { %s1969_s13 = smov 128   ;;  %s1970_s15 = smov 8  }
  0x35   : > { %1618 = dma.hbm_to_vmem [thread:$0]  (!%p2083_p11), %s2433_s2, 512, %s2076_s9, [#allocation7], %s1969_s13, %s1969_s13, %s1970_s15  }
  0x36   : > { %s2435_s3 = sld [smem:[#allocation21_spill]] }
  0x3c   : > { %s1754_s28 = scalar_lea.hbm %s2435_s3, 512 }
  0x3d   : > { %p1755_p1 = scmp.ne.s32.totalorder %s2435_s3, %s1754_s28  ;;  %p1761_p10 = scmp.lt.u32.totalorder %s1754_s28, %s2435_s3 }
  0x3f   : > { %p1757_p2 = pnand %p1755_p1, %p2099_p13 }
  0x41   : > { %p1758_p6 = pneg %p1757_p2 }
  0x43   : > { %p1763_p3 = pnand %p1761_p10, %p1758_p6 }
  0x45   : > { %1766 = shalt.err (!%p1763_p3)
}
  0x46   : > { %s1767_s9 = scalar_lea.vmem %s2087_s12, 512  ;;  %p1775_p12 = scmp.lt.s32.totalorder %s2087_s12, %s2087_s12 }
  0x47   : > { %p1768_p5 = scmp.ne.s32.totalorder %s2087_s12, %s1767_s9  ;;  %p1776_p0 = scmp.lt.s32.totalorder %s1767_s9, %s1767_s9 }
  0x49   : > { %p1770_p7 = pnand %p1768_p5, %p2099_p13  ;;  %p1777_p1 = por %p1776_p0, %p1775_p12 }
  0x4b   : > { %p1771_p9 = pneg %p1770_p7 }
  0x4d   : > { %p1778_p2 = pnand %p1777_p1, %p1771_p9 }
  0x4f   : > { %1781 = shalt.err (!%p1778_p2)
}
  0x50   : > { %1621 = dma.hbm_to_vmem [thread:$0]  (!%p2083_p11), %s2435_s3, 512, %s2087_s12, [#allocation10], %s1969_s13, %s1969_s13, %s1970_s15  }
  0x51   : > { %s2436_s4 = sld [smem:[#allocation22_spill]] }
  0x57   : > { %s1782_s18 = scalar_lea.hbm %s2436_s4, 512 }
  0x58   : > { %p1783_p6 = scmp.ne.s32.totalorder %s2436_s4, %s1782_s18  ;;  %p1789_p5 = scmp.lt.u32.totalorder %s1782_s18, %s2436_s4 }
  0x5a   : > { %p1785_p10 = pnand %p1783_p6, %p2099_p13 }
  0x5c   : > { %p1786_p3 = pneg %p1785_p10 }
  0x5e   : > { %p1791_p7 = pnand %p1789_p5, %p1786_p3 }
  0x60   : > { %1794 = shalt.err (!%p1791_p7)
}
  0x61   : > { %s1795_s9 = scalar_lea.vmem %s248_s14, 512  ;;  %p1803_p1 = scmp.lt.s32.totalorder %s248_s14, %s248_s14 }
  0x62   : > { %p1796_p9 = scmp.ne.s32.totalorder %s248_s14, %s1795_s9  ;;  %p1804_p2 = scmp.lt.s32.totalorder %s1795_s9, %s1795_s9 }
  0x64   : > { %p1798_p12 = pnand %p1796_p9, %p2099_p13  ;;  %p1805_p4 = por %p1804_p2, %p1803_p1 }
  0x66   : > { %p1799_p0 = pneg %p1798_p12 }
  0x68   : > { %p1806_p8 = pnand %p1805_p4, %p1799_p0 }
  0x6a   : > { %1809 = shalt.err (!%p1806_p8)
}
  0x6b   : > { %1624 = dma.hbm_to_vmem [thread:$0]  (!%p2083_p11), %s2436_s4, 512, %s248_s14, [#allocation10], %s1969_s13, %s1969_s13, %s1970_s15  }
  0x6c   : > { %s47_s20 = sadd.s32 1, %s1952_s23  ;;  %s38_s10 = sadd.s32 1, %s1960_s25 }
  0x6d   : > { %p54_p4 = scmp.ne.s32.totalorder %s1952_s23, %s1948_s22  ;;  %p40_p8 = scmp.ge.s32.totalorder %s38_s10, 2 }
  0x6e   : > { %p55_p13 = scmp.eq.s32.totalorder %s1964_s26, 0  ;;  %p2437_p6 = scmp.eq.s32.totalorder %s2053_s27, 1 }
  0x6f   : > { %p1639_p3 = scmp.lt.s32.totalorder %s1964_s26, 2  ;;  %s2457_s10 = smov (%p40_p8, %s38_s10), 0 }
  0x70   : > { %p2178_p10 = por %p2437_p6, %p54_p4  ;;  %p56_p5 = por %p55_p13, %p54_p4 }
  0x71   : > { %s264_s16 = sand.u32 1, %s1952_s23   ;;  %s42_s17 = ssub.s32 %s1960_s25, %s2457_s10 }
  0x72   : > { %s2438_s30 = scalar_select %p2178_p10, 1, 0 }
  0x73   : > { %p45_p11 = scmp.eq.s32.totalorder %s42_s17, 0  ;;  %s2188_s14 = sshll.u32 %s264_s16, 3 }
  0x74   : > { %s1445_s13 = sshll.u32 %s1960_s25, 7  ;;  %s268_s8 = scalar_lea.vmem [#allocation3], %s2188_s14 }
  0x75   : > { %s2192_s15 = scalar_select %p45_p11, %s1952_s23, %s47_s20  }
  0x76   : > { %s2197_s28 = scalar_lea.hbm %s2411_s0, %s1445_s13  ;;  %s276_s11 = sshll.u32 %s268_s8, 4  ;;  %s2200_s11 = int_to_ptr.vmem [resolvable:$true] %s276_s11 }
  0x77   : > { %p2204_p7 = pnand %p1639_p3, %p56_p5  ;;  %s2211_s20 = scalar_lea.hbm %s2412_s1, %s1445_s13 }
  0x78   : > { %s283_s17 = sand.u32 1, %s1964_s26   ;;  %s265_s18 = scalar_lea.sflag [#allocation4], %s264_s16 }
  0x79   : > { %s1810_s19 = scalar_lea.hbm %s2197_s28, 128  ;;  %p1812_p12 = pneg %p2204_p7 }
  0x7a   : > { %p1811_p9 = scmp.ne.s32.totalorder %s2197_s28, %s1810_s19  ;;  %s1815_s3 = scalar_lea.hbm %s2411_s0, 256 }
  0x7b   : > { %p1816_p2 = scmp.lt.u32.totalorder %s2197_s28, %s2411_s0  ;;  %p1817_p4 = scmp.lt.u32.totalorder %s1815_s3, %s1810_s19 }
  0x7c   : > { %p1813_p0 = pnand %p1812_p12, %p1811_p9  ;;  %p1819_p13 = scmp.lt.u32.totalorder %s1810_s19, %s2197_s28 }
  0x7d   : > { %p1818_p8 = por %p1817_p4, %p1816_p2 }
  0x7e   : > { %p1814_p1 = pneg %p1813_p0 }
  0x7f   : > { %p1820_p6 = por %p1819_p13, %p1818_p8 }
  0x81   : > { %p1821_p3 = pnand %p1820_p6, %p1814_p1 }
  0x83   : > { %1824 = shalt.err (!%p1821_p3)
}
  0x84   : > { %s1825_s16 = scalar_lea.vmem %s2200_s11, 128  ;;  %s1971_s2 = smov [#allocation3]  }
  0x85   : > { %p1826_p5 = scmp.ne.s32.totalorder %s2200_s11, %s1825_s16  ;;  %s1830_s13 = sshll.u32 %s1971_s2, 4  ;;  %s1831_s13 = int_to_ptr.vmem [resolvable:$false] %s1830_s13 }
  0x86   : > { %s1832_s4 = scalar_lea.vmem %s1831_s13, 256  ;;  %p1833_p0 = scmp.lt.s32.totalorder %s2200_s11, %s1831_s13 }
  0x87   : > { %p1828_p11 = pnand %p1826_p5, %p1812_p12  ;;  %p1834_p2 = scmp.lt.s32.totalorder %s1832_s4, %s1825_s16 }
  0x89   : > { %p1829_p9 = pneg %p1828_p11  ;;  %p1835_p4 = por %p1834_p2, %p1833_p0 }
  0x8b   : > { %p1836_p8 = pnand %p1835_p4, %p1829_p9 }
  0x8d   : > { %1839 = shalt.err (!%p1836_p8)
}
  0x8e   : > { %1628 = dma.hbm_to_vmem [thread:$0]  (!%p2204_p7), %s2197_s28, 128, %s2200_s11, %s265_s18  }
  0x8f   : > { %s287_s3 = scalar_lea.vmem [#allocation6], %s2188_s14  ;;  %s284_s19 = scalar_lea.sflag [#allocation7], %s283_s17 }
  0x90   : > { %s294_s21 = sshll.u32 %s287_s3, 4  ;;  %s1840_s8 = scalar_lea.hbm %s2211_s20, 128  ;;  %s295_s21 = int_to_ptr.vmem [resolvable:$true] %s294_s21 }
  0x91   : > { %p1841_p1 = scmp.ne.s32.totalorder %s2211_s20, %s1840_s8  ;;  %s1845_s2 = scalar_lea.hbm %s2412_s1, 256 }
  0x92   : > { %p1846_p3 = scmp.lt.u32.totalorder %s2211_s20, %s2412_s1  ;;  %p1847_p5 = scmp.lt.u32.totalorder %s1845_s2, %s1840_s8 }
  0x93   : > { %p1843_p13 = pnand %p1841_p1, %p1812_p12  ;;  %p1849_p9 = scmp.lt.u32.totalorder %s1840_s8, %s2211_s20 }
  0x94   : > { %p1848_p11 = por %p1847_p5, %p1846_p3 }
  0x95   : > { %p1844_p6 = pneg %p1843_p13 }
  0x96   : > { %p1850_p0 = por %p1849_p9, %p1848_p11 }
  0x98   : > { %p1851_p2 = pnand %p1850_p0, %p1844_p6 }
  0x9a   : > { %1854 = shalt.err (!%p1851_p2)
}
  0x9b   : > { %s1855_s14 = scalar_lea.vmem %s295_s21, 128  ;;  %s1972_s28 = smov [#allocation6]  }
  0x9c   : > { %p1856_p4 = scmp.ne.s32.totalorder %s295_s21, %s1855_s14  ;;  %s1860_s11 = sshll.u32 %s1972_s28, 4  ;;  %s1861_s11 = int_to_ptr.vmem [resolvable:$false] %s1860_s11 }
  0x9d   : > { %s1862_s17 = scalar_lea.vmem %s1861_s11, 256  ;;  %p1863_p13 = scmp.lt.s32.totalorder %s295_s21, %s1861_s11 }
  0x9e   : > { %p1858_p8 = pnand %p1856_p4, %p1812_p12  ;;  %p1864_p10 = scmp.lt.s32.totalorder %s1862_s17, %s1855_s14 }
  0xa0   : > { %p1859_p1 = pneg %p1858_p8  ;;  %p1865_p3 = por %p1864_p10, %p1863_p13 }
  0xa2   : > { %p1866_p5 = pnand %p1865_p3, %p1859_p1 }
  0xa4   : > { %1869 = shalt.err (!%p1866_p5)
}
  0xa5   : > { %1631 = dma.hbm_to_vmem [thread:$0]  (!%p2204_p7), %s2211_s20, 128, %s295_s21, %s284_s19  }
  0xa6   : > { %p2440_p6 = scmp.ne.s32.totalorder %s2431_s7, 0 }
  0xa7   : > { %s2264_s18 = sand.u32 (!%p2440_p6), 1, %s1948_s22   ;;  %p2441_p10 = scmp.ne.s32.totalorder (!%p2440_p6), %s2428_s29, 0 }
  0xa8   : > { %303 = sbr.rel (%p2440_p6) target bundleno = 1471 (0x5bf), region = 44  ;;  %s2267_s3 = sshll.u32 (!%p2440_p6), %s2264_s18, 3 }
  0xa9   : > { %s306_s8 = scalar_lea.sflag (!%p2440_p6), [#allocation4], %s2264_s18  ;;  %s309_s12 = scalar_lea.vmem (!%p2440_p6), [#allocation3], %s2267_s3 }
  0xaf   : > { %1923 = dma.done.wait (%p2441_p10), %s306_s8, 128  }
  0xb0   : > { %1925 = vsyncadd (%p2441_p10), %s306_s8, 4294967168  ;;  %s314_s7 = sand.u32 1, %s2053_s27   ;;  %s318_s20 = scalar_lea.vmem [#allocation6], %s2267_s3 }
  0xb1   : > { %s315_s9 = scalar_lea.sflag [#allocation7], %s314_s7 }
  0xb2   : > { %1927 = dma.done.wait (%p2441_p10), %s315_s9, 128  }
  0xb3   : > { %1929 = vsyncadd (%p2441_p10), %s315_s9, 4294967168  ;;  %p2442_p7 = scmp.eq.s32.totalorder %s2053_s27, 0 }
  0xb5   : > { %1931 = dma.done.wait (%p2442_p7), [#allocation7], 512   ;;  %p2443_p12 = pmov %p2442_p7 }
  0xb6   : > { %p2444_p11 = pmov %p2442_p7 }
  0xb7   : > { %1933 = vsyncadd (%p2443_p12), [#allocation7], 4294966784 }
  0xb8   : > { %1935 = dma.done.wait (%p2444_p11), [#allocation10], 1024   ;;  %p2445_p9 = pmov %p2442_p7 }
  0xb9   : > { %v1973_v0 = vmov 0.0|0.0   ;;  %vm1974_vm0 = vmmov 0   ;;  %v1975_v1 = vmov 0.0   ;;  %v369_v2 = vld [vmem:[#allocation9] sm:$0xff]  ;;  %v370_v3 = vld [vmem:[#allocation9 + $0x8] sm:$0xff]  ;;  %v371_v4 = vld [vmem:[#allocation9 + $0x10] sm:$0xff] }
  0xba   : > { %1937 = vsyncadd (%p2445_p9), [#allocation10], 4294966272  ;;  %1579 = vmatprep.subr.bf16.mxu0 %v1973_v0  ;;  %1514 = vmatprep.mubr.msk.f32.mxu0 %vm1974_vm0, %v1975_v1  ;;  %v1580_v5 = vpack.c.bf16 %v370_v3, %v369_v2  ;;  %v372_v6 = vld [vmem:[#allocation9 + $0x18] sm:$0xff]  ;;  %v450_v7 = vld [vmem:[#allocation8] sm:$0xff]  ;;  %vm373_vm1 = vcmask 261120   ;;  %vm447_vm2 = vcmask 523264  }
  0xbb   : > { %1585 = vmatprep.subr.bf16.mxu1 %v1973_v0  ;;  %1525 = vmatprep.mubr.msk.f32.mxu1 %vm1974_vm0, %v1975_v1  ;;  %v451_v8 = vld [vmem:[#allocation8 + $0x8] sm:$0xff]  ;;  %v452_v9 = vld [vmem:[#allocation8 + $0x10] sm:$0xff]  ;;  %v453_v10 = vld [vmem:[#allocation8 + $0x18] sm:$0xff]  ;;  %v1583_v11 = vpack.c.bf16 %v372_v6, %v371_v4  ;;  %vm530_vm3 = vcmask 64512   ;;  %s1976_s27 = smov 112   ;;  %s1977_s29 = smov 120  }
  0xbc   : > { %1581 = vmatpush3.bf16.msra.mxu0 %v1580_v5  ;;  %v1586_v12 = vpack.c.bf16 %v451_v8, %v450_v7  ;;  %v1589_v13 = vpack.c.bf16 %v453_v10, %v452_v9  ;;  %v368_v14 = vld [vmem:[%s318_s20] sm:$0xff]  ;;  %v449_v15 = vld [vmem:[%s309_s12] sm:$0xff]  ;;  %s1978_s21 = smov 104   ;;  %s1979_s19 = smov 96   ;;  %vm1202_vm4 = vcmask 130048   ;;  %vm1204_vm5 = vcmask 195584  }
  0xbd   : > { %1582 = vmatprep.subr.bf16.mxu0 %v1973_v0  ;;  %s1980_s16 = smov 80   ;;  %s1981_s2 = smov 72   ;;  %v1206_v5 = vld [vmem:[#allocation11] sm:$0xff]  ;;  %v1207_v6 = vld [vmem:[#allocation11 + $0x8] sm:$0xff]  ;;  %v1209_v9 = vld [vmem:[#allocation11 + $0x18] sm:$0xff] }
  0xbe   : > { %1587 = vmatpush3.bf16.msra.mxu1 %v1586_v12  ;;  %s1982_s13 = smov 88   ;;  %v1592_v8 = vpack.c.bf16 %v1207_v6, %v1206_v5  ;;  %s1983_s4 = smov 8  }
  0xbf   : > { %1588 = vmatprep.subr.bf16.mxu1 %v1973_v0  ;;  %s1984_s14 = smov 16   ;;  %s1985_s28 = smov 24  }
  0xc0   : > { %1584 = vmatpush3.bf16.msra.mxu0 %v1583_v11  ;;  %s1472_s8 = sshll.u32 %s1956_s24, 7  ;;  %s363_s12 = scalar_lea.vmem [#allocation12], %s2267_s3 }
  0xc1   : > { %1538 = vmatprep.subr.mxu0 %v1975_v1  ;;  %s1306_s7 = sshll.u32 %s363_s12, 4  ;;  %p2446_p2 = scmp.ne.s32.totalorder %s2438_s30, 0  ;;  %s2363_s7 = int_to_ptr.vmem [resolvable:$true] %s1306_s7 }
  0xc2   : > { %1590 = vmatpush3.bf16.msra.mxu1 %v1589_v13  ;;  %s1986_s24 = smov [#allocation12]  }
  0xc3   : > { %1515 = vmatmul.mubr.msk.f32.vlgmr.msra.gmra.mrb[0].mxu0 %vm373_vm1, %v368_v14  ;;  %1528 = vmatprep.subr.mxu1 %v1975_v1  ;;  %s1874_s3 = sshll.u32 %s1986_s24, 4  ;;  %s1875_s3 = int_to_ptr.vmem [resolvable:$false] %s1874_s3 }
  0xc4   : > { %1540 = vmatprep.mubr.msk.f32.mxu0 %vm1974_vm0, %v1975_v1  ;;  %p1877_p1 = scmp.lt.s32.totalorder %s2363_s7, %s1875_s3 }
  0xc5   : > { %1526 = vmatmul.mubr.msk.f32.vlgmr.msra.gmra.mrb[0].mxu1 %vm373_vm1, %v449_v15 }
  0xc6   : > { %1530 = vmatprep.mubr.msk.f32.mxu1 %vm1974_vm0, %v1975_v1 }
 0x196   : > { %v443_v16 = vpop.f32.mrb[0].mxu0 }
 0x197   : > { %448 = vst.msk [vmem:[#allocation2] sm:$0xff] %vm447_vm2, %v443_v16  ;;  %v1516_v17 = vpop.f32.mrb[1].mxu0 }
 0x198   : > { %v524_v18 = vpop.f32.mrb[0].mxu1 }
 0x199   : > { %v1527_v19 = vpop.f32.mrb[1].mxu1  ;;  %v528_v21 = vmul.f32 0.17677669, %v524_v18 }
 0x19e   : > { %v529_v20 = vld [vmem:[#allocation2] sm:$0xff] }
 0x19f   : > { %861 = vrot.lane.b32.xlu1 %v529_v20, %s1976_s27  ;;  %696 = vrot.lane.b32.xlu0 %v529_v20, %s1977_s29 }
 0x1a0   : > { %1529 = vmatpush3.xpose.msk.msra.mxu1 %vm530_vm3, %v529_v20 }
 0x1a1   : > { %1533 = vmatprep.subr.mxu1 %v1975_v1 }
 0x1a3   : > { %1531 = vmatmul.mubr.msk.f32.vlgmr.msra.gmra.mrb[2].mxu1 %vm530_vm3, %v528_v21  ;;  %859 = vrot.lane.b32.xlu1 %v528_v21, %s1976_s27  ;;  %s2361_s27 = scalar_lea.hbm %s2417_s6, %s1472_s8 }
 0x1a4   : > { %694 = vrot.lane.b32.xlu0 %v528_v21, %s1977_s29  ;;  %1535 = vmatprep.mubr.msk.f32.mxu1 %vm1974_vm0, %v1975_v1  ;;  %s1292_s29 = scalar_lea.sflag [#allocation5], %s2264_s18 }
 0x1a7   : > { %1024 = vrot.lane.b32.xlu1 %v528_v21, %s1978_s21 }
 0x1a8   : > { %1026 = vrot.lane.b32.xlu0 %v529_v20, %s1978_s21  ;;  %s1870_s21 = scalar_lea.vmem %s2363_s7, 128 }
 0x1a9   : > { %p1871_p0 = scmp.ne.s32.totalorder %s2363_s7, %s1870_s21 }
 0x1ab   : > { %616 = vrot.lane.b32.xlu1 %v529_v20, %s1979_s19  ;;  %p1872_p4 = pnand %p1871_p0, %p2446_p2  ;;  %s1876_s19 = scalar_lea.vmem %s1875_s3, 256 }
 0x1ac   : > { %p1878_p13 = scmp.lt.s32.totalorder %s1876_s19, %s1870_s21 }
 0x1ad   : > { %p1873_p8 = pneg %p1872_p4 }
 0x1ae   : > { %p1879_p3 = por %p1878_p13, %p1877_p1 }
 0x1b0   : > { %p1880_p5 = pnand %p1879_p3, %p1873_p8 }
 0x211   : > { %v862_v22 = vpop.permute.xlu1 %861  ;;  %v697_v23 = vpop.permute.xlu0 %696 }
 0x212   : > { %1539 = vmatpush3.xpose.msk.msra.mxu0 %vm530_vm3, %v697_v23 }
 0x213   : > { %1548 = vmatprep.subr.mxu0 %v1975_v1 }
 0x215   : > { %v860_v24 = vpop.permute.xlu1 %859 }
 0x216   : > { %v695_v25 = vpop.permute.xlu0 %694 }
 0x217   : > { %1541 = vmatmul.mubr.msk.f32.vlgmr.msra.gmra.mrb[2].mxu0 %vm530_vm3, %v695_v25 }
 0x218   : > { %1549 = vmatpush3.xpose.msk.msra.mxu0 %vm530_vm3, %v862_v22  ;;  %1550 = vmatprep.mubr.msk.f32.mxu0 %vm1974_vm0, %v1975_v1 }
 0x219   : > { %v1025_v26 = vpop.permute.xlu1 %1024  ;;  %1558 = vmatprep.subr.mxu0 %v1975_v1 }
 0x21a   : > { %v1027_v27 = vpop.permute.xlu0 %1026 }
 0x21b   : > { %1551 = vmatmul.mubr.msk.f32.vlgmr.msra.gmra.mrb[4].mxu0 %vm530_vm3, %v860_v24 }
 0x21c   : > { %1559 = vmatpush3.xpose.msk.msra.mxu0 %vm530_vm3, %v1027_v27  ;;  %1560 = vmatprep.mubr.msk.f32.mxu0 %vm1974_vm0, %v1975_v1 }
 0x21d   : > { %v617_v28 = vpop.permute.xlu1 %616  ;;  %1591 = vmatprep.subr.bf16.mxu0 %v1973_v0 }
 0x21e   : > { %1534 = vmatpush3.msra.mxu1 %v617_v28 }
 0x21f   : > { %1561 = vmatmul.mubr.msk.f32.vlgmr.msra.gmra.mrb[6].mxu0 %vm530_vm3, %v1025_v26  ;;  %1543 = vmatprep.subr.mxu1 %v1975_v1 }
 0x220   : > { %1576 = vmatprep.mubr.msk.f32.mxu0 %vm1974_vm0, %v1975_v1  ;;  %1593 = vmatpush3.bf16.msra.mxu0 %v1592_v8 }
 0x221   : > { %1594 = vmatprep.subr.bf16.mxu0 %v1973_v0 }
 0x276   : > { %v603_v29 = vpop.f32.mrb[2].mxu1 }
 0x277   : > { %v1532_v30 = vpop.f32.mrb[3].mxu1  ;;  %v607_v31 = vsel %vm530_vm3, %v603_v29, -inf }
 0x278   : > { %608 = vmax.xlane.f32.xlu0 %v607_v31 }
 0x2ea   : > { %v768_v32 = vpop.f32.mrb[2].mxu0 }
 0x2eb   : > { %v1542_v33 = vpop.f32.mrb[3].mxu0  ;;  %v772_v34 = vsel %vm530_vm3, %v768_v32, -inf }
 0x2ec   : > { %773 = vmax.xlane.f32.xlu1 %v772_v34 }
 0x2ee   : > { %v933_v35 = vpop.f32.mrb[4].mxu0 }
 0x2ef   : > { %v1552_v36 = vpop.f32.mrb[5].mxu0  ;;  %v937_v37 = vsel %vm530_vm3, %v933_v35, -inf }
 0x2f0   : > { %938 = vmax.xlane.f32.xlu0 %v937_v37 }
 0x2f2   : > { %v1098_v38 = vpop.f32.mrb[6].mxu0 }
 0x2f3   : > { %v1562_v39 = vpop.f32.mrb[7].mxu0  ;;  %v1102_v40 = vsel %vm530_vm3, %v1098_v38, -inf }
 0x2f4   : > { %1103 = vmax.xlane.f32.xlu0 %v1102_v40 }
 0x2fd   : > { %946 = vrot.lane.b32.xlu1 %v529_v20, %s1980_s16 }
 0x301   : > { %1111 = vrot.lane.b32.xlu1 %v529_v20, %s1981_s2 }
 0x305   : > { %v609_v41 = vpop.xlane.xlu0 %608 }
 0x306   : > { %v610_v42 = vsub.f32 %v603_v29, %v609_v41 }
 0x308   : > { %v611_v43 = vmul.f32 1.442695, %v610_v42 }
 0x30a   : > { %1710 = vpow2.f32 %v611_v43  ;;  %781 = vrot.lane.b32.xlu0 %v529_v20, %s1982_s13 }
 0x314   : > { %v1711_v44 = vpop.eup %1710 }
 0x315   : > { %1536 = vmatmul.mubr.msk.f32.vlgmr.msra.gmra.mrb[4].mxu1 %vm530_vm3, %v1711_v44  ;;  %v613_v63 = vsel %vm530_vm3, %v1711_v44, 0.0 }
 0x316   : > { %1545 = vmatprep.mubr.msk.f32.mxu1 %vm1974_vm0, %v1975_v1 }
 0x379   : > { %v774_v45 = vpop.xlane.xlu1 %773 }
 0x37a   : > { %v775_v46 = vsub.f32 %v768_v32, %v774_v45  ;;  %v1469_v32 = vld [vmem:[%s2416_s5] ss:$0 sm:$0xff] }
 0x37c   : > { %v776_v47 = vmul.f32 1.442695, %v775_v46 }
 0x37d   : > { %v939_v48 = vpop.xlane.xlu0 %938  ;;  %v947_v55 = vpop.permute.xlu1 %946 }
 0x37e   : > { %1712 = vpow2.f32 %v776_v47  ;;  %v940_v49 = vsub.f32 %v933_v35, %v939_v48 }
 0x380   : > { %v941_v50 = vmul.f32 1.442695, %v940_v49 }
 0x381   : > { %v1104_v51 = vpop.xlane.xlu0 %1103  ;;  %v1112_v59 = vpop.permute.xlu1 %1111 }
 0x382   : > { %1714 = vpow2.f32 %v941_v50  ;;  %v1105_v52 = vsub.f32 %v1098_v38, %v1104_v51 }
 0x384   : > { %v1106_v53 = vmul.f32 1.442695, %v1105_v52 }
 0x385   : > { %v782_v54 = vpop.permute.xlu0 %781 }
 0x386   : > { %1716 = vpow2.f32 %v1106_v53  ;;  %1544 = vmatpush3.msra.mxu1 %v782_v54 }
 0x387   : > { %1553 = vmatprep.subr.mxu1 %v1975_v1 }
 0x388   : > { %v1713_v56 = vpop.eup %1712 }
 0x389   : > { %1546 = vmatmul.mubr.msk.f32.vlgmr.msra.gmra.mrb[6].mxu1 %vm530_vm3, %v1713_v56  ;;  %v778_v57 = vsel %vm530_vm3, %v1713_v56, 0.0 }
 0x38a   : > { %1554 = vmatpush3.msra.mxu1 %v947_v55  ;;  %779 = vadd.xlane.f32.xlu0 %v778_v57 }
 0x38b   : > { %1555 = vmatprep.mubr.msk.f32.mxu1 %vm1974_vm0, %v1975_v1  ;;  %1563 = vmatprep.subr.mxu1 %v1975_v1 }
 0x38c   : > { %v1715_v58 = vpop.eup %1714 }
 0x38d   : > { %1556 = vmatmul.mubr.msk.f32.vlgmr.msra.gmra.mrb[8].mxu1 %vm530_vm3, %v1715_v58  ;;  %v943_v60 = vsel %vm530_vm3, %v1715_v58, 0.0 }
 0x38e   : > { %1564 = vmatpush3.msra.mxu1 %v1112_v59  ;;  %944 = vadd.xlane.f32.xlu1 %v943_v60 }
 0x38f   : > { %1565 = vmatprep.mubr.msk.f32.mxu1 %vm1974_vm0, %v1975_v1  ;;  %v1208_v1 = vld [vmem:[#allocation11 + $0x10] sm:$0xff] }
 0x390   : > { %v1717_v61 = vpop.eup %1716  ;;  %v1595_v11 = vpack.c.bf16 %v1209_v9, %v1208_v1 }
 0x391   : > { %1566 = vmatmul.mubr.msk.f32.vlgmr.msra.gmra.mrb[10].mxu1 %vm530_vm3, %v1717_v61  ;;  %v1108_v62 = vsel %vm530_vm3, %v1717_v61, 0.0 }
 0x392   : > { %1109 = vadd.xlane.f32.xlu0 %v1108_v62  ;;  %1596 = vmatpush3.bf16.msra.mxu0 %v1595_v11 }
 0x396   : > { %614 = vadd.xlane.f32.xlu0 %v613_v63 }
 0x3e8   : > { %v688_v2 = vpop.f32.mrb[4].mxu1 }
 0x3e9   : > { %v1537_v3 = vpop.f32.mrb[5].mxu1 }
 0x417   : > { %v780_v4 = vpop.xlane.xlu0 %779 }
 0x418   : > { %1718 = vrcp.f32 %v780_v4 }
 0x41b   : > { %v945_v7 = vpop.xlane.xlu1 %944 }
 0x41c   : > { %1720 = vrcp.f32 %v945_v7 }
 0x41f   : > { %v1110_v10 = vpop.xlane.xlu0 %1109 }
 0x420   : > { %1722 = vrcp.f32 %v1110_v10 }
 0x422   : > { %v1719_v12 = vpop.eup %1718 }
 0x423   : > { %v615_v23 = vpop.xlane.xlu0 %614 }
 0x424   : > { %1724 = vrcp.f32 %v615_v23 }
 0x426   : > { %v1721_v16 = vpop.eup %1720 }
 0x42a   : > { %v1723_v20 = vpop.eup %1722 }
 0x42e   : > { %v1725_v24 = vpop.eup %1724 }
 0x42f   : > { %v693_v26 = vmul.f32 %v1725_v24, %v688_v2 }
 0x45c   : > { %v853_v13 = vpop.f32.mrb[6].mxu1 }
 0x45d   : > { %v858_v14 = vmul.f32 %v1719_v12, %v853_v13  ;;  %v1547_v15 = vpop.f32.mrb[7].mxu1 }
 0x45f   : > { %1190 = vrot.lane.b32.xlu1 %v858_v14, %s1983_s4 }
 0x460   : > { %v1018_v17 = vpop.f32.mrb[8].mxu1 }
 0x461   : > { %v1023_v18 = vmul.f32 %v1721_v16, %v1018_v17  ;;  %v1557_v19 = vpop.f32.mrb[9].mxu1 }
 0x463   : > { %1194 = vrot.lane.b32.xlu0 %v1023_v18, %s1984_s14 }
 0x464   : > { %v1183_v0 = vpop.f32.mrb[10].mxu1 }
 0x465   : > { %v1188_v21 = vmul.f32 %v1723_v20, %v1183_v0  ;;  %v1567_v22 = vpop.f32.mrb[11].mxu1 }
 0x467   : > { %1198 = vrot.lane.b32.xlu1 %v1188_v21, %s1985_s28 }
 0x4d1   : > { %v1191_v25 = vpop.permute.xlu1 %1190 }
 0x4d2   : > { %v1201_v28 = vsel %vm530_vm3, %v693_v26, %v1191_v25 }
 0x4d5   : > { %v1195_v27 = vpop.permute.xlu0 %1194 }
 0x4d6   : > { %v1203_v29 = vsel %vm1202_vm4, %v1201_v28, %v1195_v27 }
 0x4d9   : > { %v1199_v30 = vpop.permute.xlu1 %1198 }
 0x4da   : > { %v1205_v31 = vsel %vm1204_vm5, %v1203_v29, %v1199_v30 }
 0x4db   : > { %1577 = vmatmul.mubr.msk.f32.vlgmr.msra.gmra.mrb[8].mxu0 %vm373_vm1, %v1205_v31 }
 0x5ae   : > { %v1286_v33 = vpop.f32.mrb[8].mxu0 }
 0x5af   : > { %v1287_v34 = vadd.f32 %v1469_v32, %v1286_v33  ;;  %v1578_v35 = vpop.f32.mrb[9].mxu0 }
 0x5b1   : > { %1290 = vst.msk [vmem:[%s363_s12] sm:$0xff] %vm373_vm1, %v1287_v34 }
 0x5b2   : > { %1883 = shalt.err (!%p1880_p5)
}
 0x5b3   : > { %s1884_s18 = scalar_lea.hbm %s2361_s27, 128  ;;  %s1888_s13 = scalar_lea.hbm %s2417_s6, 256 }
 0x5b4   : > { %p1885_p6 = scmp.ne.s32.totalorder %s2361_s27, %s1884_s18  ;;  %p1889_p12 = scmp.lt.u32.totalorder %s2361_s27, %s2417_s6 }
 0x5b5   : > { %p1890_p11 = scmp.lt.u32.totalorder %s1888_s13, %s1884_s18  ;;  %p1892_p0 = scmp.lt.u32.totalorder %s1884_s18, %s2361_s27 }
 0x5b6   : > { %p1886_p10 = pnand %p1885_p6, %p2446_p2 }
 0x5b7   : > { %p1891_p9 = por %p1890_p11, %p1889_p12 }
 0x5b8   : > { %p1887_p7 = pneg %p1886_p10 }
 0x5b9   : > { %p1893_p4 = por %p1892_p0, %p1891_p9 }
 0x5bb   : > { %p1894_p8 = pnand %p1893_p4, %p1887_p7 }
 0x5bd   : > { %1897 = shalt.err (!%p1894_p8)
}
 0x5be   : > { %1613 = dma.vmem_to_hbm [thread:$0]  (%p2446_p2), %s2363_s7, 128, %s2361_s27, %s1292_s29  }
 0x5bf PF: > { %s2447_s28 = sld [smem:[#allocation18_spill]]  ;;  %s2448_s11 = sld [smem:[#allocation19_spill]] }
 0x5c0   : > { %p2450_p13 = scmp.ge.s32.totalorder %s1964_s26, 2 }
 0x5c5   : > { %s1318_s17 = sand.u32 1, %s2447_s28   ;;  %p2449_p1 = scmp.ne.s32.totalorder %s2448_s11, 0 }
 0x5c6   : > { %s1319_s8 = scalar_lea.sflag [#allocation5], %s1318_s17 }
 0x5c7   : > { %p1633_p3 = pnand %p2450_p13, %p2449_p1 }
 0x5c9   : > { %1939 = dma.done.wait (!%p1633_p3), %s1319_s8, 128  }
 0x5ca   : > { %1941 = vsyncadd (!%p1633_p3), %s1319_s8, 4294967168  ;;  %s26_s26 = sadd.s32 1, %s1964_s26   ;;  %s2451_s21 = smov %s1948_s22 }
 0x5cb   : > { %p23_p5 = scmp.ge.s32.totalorder %s26_s26, 4   ;;  %s2452_s22 = smov %s1952_s23 }
 0x5cc   : > { %s2453_s23 = smov %s2192_s15  ;;  %s2454_s24 = smov %s1960_s25 }
 0x5cd   : > { %s2455_s25 = smov %s2457_s10  ;;  %25 = sbr.rel (!%p23_p5) target bundleno = 13 (0xd), region = 118 }
 0x5d4   :  { %1324 = vsyncpa [#allocation4], 1 }
 0x5d5   :  { %1326 = vsyncpa [#allocation4 + $0x1], 1 }
 0x5d6   :  { %1327 = vsyncpa [#allocation7], 1 }
 0x5d7   :  { %1329 = vsyncpa [#allocation7 + $0x1], 1 }
 0x5d8   :  { %1330 = vsyncpa [#allocation10], 1 }
 0x5d9   :  { %1331 = vsyncpa [#allocation5], 1 }
 0x5da   :  { %1333 = vsyncpa [#allocation5 + $0x1], 1 }

</bundles_post_ra>
